<compile_context>
chip_gen: v7x
topology: tpu7x:2x2x1
jax: 0.10.0
libtpu: 0.0.40
codegen_flags: <defaults>
</compile_context>

<pallas_src>
import functools

import jax
import jax.numpy as jnp
from jax.experimental import pallas as pl
from jax.experimental.pallas import tpu as pltpu


def _cdiv(a: int, b: int) -> int:
    return -(-a // b)


def _round_up(x: int, m: int) -> int:
    return ((x + m - 1) // m) * m


def _vmem_cap_bytes() -> int:
    try:
        info = pltpu.get_tpu_info()
        cap = getattr(info, "vmem_capacity_bytes", None)
        if cap:
            return int(cap)
    except Exception:
        pass
    return 64 * 1024 * 1024  # conservative: v7x per-TC VMEM


# ----------------------------------------------------------------------------- kernels
def _linear_kernel_fullk(x_ref, w_ref, b_ref, o_ref):
    # Single K step: no accumulator scratch, no init/finalize gating.
    o_ref[...] = (
        jnp.dot(x_ref[...], w_ref[...], preferred_element_type=jnp.float32)
        + b_ref[...]
    ).astype(o_ref.dtype)


def _linear_kernel_acc(x_ref, w_ref, b_ref, o_ref, acc_ref):
    # Fallback for very large hidden sizes: K is the innermost ("arbitrary") axis.
    k = pl.program_id(2)

    @pl.when(k == 0)
    def _():
        acc_ref[...] = jnp.zeros_like(acc_ref)

    acc_ref[...] += jnp.dot(x_ref[...], w_ref[...],
                            preferred_element_type=jnp.float32)

    @pl.when(k == pl.num_programs(2) - 1)
    def _():
        o_ref[...] = (acc_ref[...] + b_ref[...]).astype(o_ref.dtype)


# --------------------------------------------------------------------- one-time prep
def prepare_linear_params(weight_t, bias, *, tn=1024, tk=2048, tk_max=4096):
    """One-time weight/bias preparation (call once, reuse across forward calls).

    weight_t: (H, V) f32 (transpose of nn.Linear weight)
    bias:     (V,)  f32
    Returns (weight_padded (Hp, Vp) bf16, bias_padded (1, Vp) f32).
    """
    H, V = weight_t.shape
    if H <= tk_max:
        Hp = _round_up(H, 128)          # single full-K block
    else:
        Hp = _round_up(H, tk)           # accumulator path needs tk | Hp
    tn_e = min(tn, _round_up(V, 128))
    Vp = _round_up(V, tn_e)

    w = weight_t.astype(jnp.bfloat16)
    if (Hp, Vp) != (H, V):
        w = jnp.pad(w, ((0, Hp - H), (0, Vp - V)))
    b = bias.astype(jnp.float32).reshape(1, V)
    if Vp != V:
        b = jnp.pad(b, ((0, 0), (0, Vp - V)))
    return w, b


# -------------------------------------------------------------------------- forward
@functools.partial(
    jax.jit,
    static_argnames=("vocab_size", "tm", "tn", "tk", "tk_max", "out_dtype",
                     "slice_output"),
)
def linear_textual_head(caption_tokens, caption_lengths, visual_features,
                        weight_padded, bias_padded, *, vocab_size,
                        tm=1024, tn=1024, tk=2048, tk_max=4096,
                        out_dtype=None, slice_output=True):
    """Pallas implementation of LinearTextualHead.forward.

    caption_tokens / caption_lengths are ignored (same as the reference module).
    visual_features: (B, S, H) float32
    weight_padded:   (Hp, Vp)  bfloat16   from prepare_linear_params
    bias_padded:     (1, Vp)   float32    from prepare_linear_params
    returns:         (B, S, V) out_dtype  (or (B, S, Vp) if slice_output=False)
    """
    del caption_tokens, caption_lengths  # unused, per reference forward
    B, S, H = visual_features.shape
    Hp, Vp = weight_padded.shape
    M = B * S
    out_dtype = visual_features.dtype if out_dtype is None else out_dtype
    out_bytes = jnp.dtype(out_dtype).itemsize

    # Balanced M tiling: as few i-blocks as possible, without padding M up to a
    # full multiple of tm (e.g. M=300 pads to 304, not 512).
    nb_i = max(1, _cdiv(M, tm))
    tm_e = _round_up(_cdiv(M, nb_i), 16)
    Mp = nb_i * tm_e

    tn_e = min(tn, Vp)
    assert Vp % tn_e == 0, "weight/bias not prepared with the same tn"

    # Activations are small relative to the weight: per-call bf16 cast + pad is cheap.
    x2d = visual_features.reshape(M, H).astype(jnp.bfloat16)
    if (Mp, Hp) != (M, H):
        x2d = jnp.pad(x2d, ((0, Mp - M), (0, Hp - H)))

    use_acc = Hp > tk_max

    if not use_acc:
        tk_e = Hp                               # full hidden dim, K-grid == 1
        grid = (nb_i, Vp // tn_e)
        kernel = _linear_kernel_fullk
        in_specs = [
            pl.BlockSpec((tm_e, tk_e), lambda i, j: (i, 0)),   # activations
            pl.BlockSpec((tk_e, tn_e), lambda i, j: (0, j)),   # weight
            pl.BlockSpec((1, tn_e), lambda i, j: (0, j)),      # bias
        ]
        out_spec = pl.BlockSpec((tm_e, tn_e), lambda i, j: (i, j))
        scratch = []
        semantics = ("parallel", "parallel")
    else:
        tk_e = min(tk, Hp)
        assert Hp % tk_e == 0, "weight not prepared with the same tk"
        grid = (nb_i, Vp // tn_e, Hp // tk_e)
        kernel = _linear_kernel_acc
        in_specs = [
            pl.BlockSpec((tm_e, tk_e), lambda i, j, k: (i, k)),
            pl.BlockSpec((tk_e, tn_e), lambda i, j, k: (k, j)),
            pl.BlockSpec((1, tn_e), lambda i, j, k: (0, j)),
        ]
        out_spec = pl.BlockSpec((tm_e, tn_e), lambda i, j, k: (i, j))
        scratch = [pltpu.VMEM((tm_e, tn_e), jnp.float32)]
        semantics = ("parallel", "parallel", "arbitrary")

    # VMEM: double-buffered input/output tiles (+ single f32 scratch on the acc path),
    # capped at 3/4 of the chip's VMEM so Mosaic keeps headroom (v7x: 64 MiB/TC).
    vmem_needed = 2 * (tm_e * tk_e * 2 + tk_e * tn_e * 2 + tn_e * 4
                       + tm_e * tn_e * out_bytes)
    if use_acc:
        vmem_needed += tm_e * tn_e * 4
    budget_cap = (3 * _vmem_cap_bytes()) // 4
    vmem_limit = int(min(max(vmem_needed + (4 << 20), 32 << 20), budget_cap))

    cost = pl.CostEstimate(
        flops=2 * M * H * vocab_size,
        transcendentals=0,
        bytes_accessed=(M * Hp + Hp * Vp) * 2 + Vp * 4 + Mp * Vp * out_bytes,
    )

    out = pl.pallas_call(
        kernel,
        out_shape=jax.ShapeDtypeStruct((Mp, Vp), out_dtype),
        grid=grid,
        in_specs=in_specs,
        out_specs=out_spec,
        scratch_shapes=scratch,
        compiler_params=pltpu.CompilerParams(
            dimension_semantics=semantics,
            vmem_limit_bytes=vmem_limit),
        cost_estimate=cost,
    )(x2d, weight_padded, bias_padded)

    if slice_output:
        return out[:M, :vocab_size].reshape(B, S, vocab_size)
    # Keep vocab padded end-to-end (consumer masks/ignores the zero-logit tail).
    return out[:M, :].reshape(B, S, Vp)


# ----------------------------------------------------------------------------- tests
def init_linear_params(key, hidden_size, vocab_size):
    # Deterministic init mirroring nn.Linear default: U(-1/sqrt(H), 1/sqrt(H)).
    kw, kb = jax.random.split(key)
    bound = 1.0 / jnp.sqrt(hidden_size)
    weight_t = jax.random.uniform(kw, (hidden_size, vocab_size),
                                  minval=-bound, maxval=bound, dtype=jnp.float32)
    bias = jax.random.uniform(kb, (vocab_size,),
                              minval=-bound, maxval=bound, dtype=jnp.float32)
    return weight_t, bias


def _run_case(key, batch, seq, hidden, vocab, *, tn=1024, tk=2048, tk_max=4096):
    k_vis, k_tok, k_par = jax.random.split(key, 3)
    visual_features = jax.random.normal(k_vis, (batch, seq, hidden), dtype=jnp.float32)
    caption_tokens = jax.random.randint(k_tok, (batch, seq), 0, vocab, dtype=jnp.int32)
    caption_lengths = jnp.full((batch,), seq, dtype=jnp.int32)
    weight_t, bias = init_linear_params(k_par, hidden, vocab)

    w_pad, b_pad = prepare_linear_params(weight_t, bias, tn=tn, tk=tk, tk_max=tk_max)
    logits = linear_textual_head(caption_tokens, caption_lengths, visual_features,
                                 w_pad, b_pad, vocab_size=vocab,
                                 tn=tn, tk=tk, tk_max=tk_max)
    logits = jax.block_until_ready(logits)

    ref = visual_features @ weight_t + bias  # f32 reference
    assert logits.shape == (batch, seq, vocab)
    # bf16 matmul with f32 accumulation vs f32 reference: relaxed tolerance.
    assert jnp.allclose(logits, ref, atol=3e-2, rtol=3e-2)
    return logits


if __name__ == "__main__":
    key = jax.random.PRNGKey(0)
    k0, k1, k2 = jax.random.split(key, 3)

    # Primary small case consistent with the module (full-K, no-accumulator path).
    _run_case(k0, batch=2, seq=8, hidden=32, vocab=128)

    # Non-tile-aligned case exercising the padding / balanced-tile / slicing path.
    _run_case(k1, batch=2, seq=7, hidden=48, vocab=300)

    # Large-hidden fallback path (K-split with f32 accumulator scratch).
    _run_case(k2, batch=2, seq=8, hidden=384, vocab=256, tn=256, tk=128, tk_max=128)

    print("KERNEL_OK")
</pallas_src>

<mosaic_0001>
module attributes {stable_mosaic.version = 11 : i64} {
  func.func @_linear_kernel_fullk(%arg0: i32, %arg1: i32, %arg2: memref<16x128xbf16, #tpu.memory_space<vmem>>, %arg3: memref<128x128xbf16, #tpu.memory_space<vmem>>, %arg4: memref<1x128xf32, #tpu.memory_space<vmem>>, %arg5: memref<16x128xf32, #tpu.memory_space<vmem>>) attributes {dimension_semantics = [#tpu.dimension_semantics<parallel>, #tpu.dimension_semantics<parallel>], iteration_bounds = array<i64: 1, 1>, scalar_prefetch = 0 : i64, scratch_operands = 0 : i64, tpu.core_type = #tpu.core_type<tc>, window_params = [{transform_indices = @transform_0, window_bounds = array<i64: 16, 128>}, {transform_indices = @transform_1, window_bounds = array<i64: 128, 128>}, {transform_indices = @transform_2, window_bounds = array<i64: 1, 128>}, {transform_indices = @transform_3, window_bounds = array<i64: 16, 128>}]} {
    %c0 = arith.constant 0 : index
    %c0_0 = arith.constant 0 : index
    %0 = vector.load %arg2[%c0, %c0_0] : memref<16x128xbf16, #tpu.memory_space<vmem>>, vector<16x128xbf16>
    %c0_1 = arith.constant 0 : index
    %c0_2 = arith.constant 0 : index
    %1 = vector.load %arg3[%c0_1, %c0_2] : memref<128x128xbf16, #tpu.memory_space<vmem>>, vector<128x128xbf16>
    %cst = arith.constant dense<0.000000e+00> : vector<16x128xf32>
    %2 = tpu.matmul %0, %1, %cst {dimension_numbers = #tpu.dot_dimension_numbers<[1], [0], [0], [1], [0, 0, 1, 1], [], []>} : vector<16x128xbf16>, vector<128x128xbf16>, vector<16x128xf32> -> vector<16x128xf32>
    %c0_3 = arith.constant 0 : index
    %c0_4 = arith.constant 0 : index
    %3 = vector.load %arg4[%c0_3, %c0_4] : memref<1x128xf32, #tpu.memory_space<vmem>>, vector<1x128xf32>
    %4 = vector.broadcast %3 : vector<1x128xf32> to vector<16x128xf32>
    %5 = arith.addf %2, %4 : vector<16x128xf32>
    %c0_5 = arith.constant 0 : index
    %c0_6 = arith.constant 0 : index
    %6 = vector.load %arg5[%c0_5, %c0_6] : memref<16x128xf32, #tpu.memory_space<vmem>>, vector<16x128xf32>
    tpu.vector_store %arg5[%c0_5, %c0_6], %5 {strides = array<i32>} : memref<16x128xf32, #tpu.memory_space<vmem>>, vector<16x128xf32>,
    return
  }
  func.func @transform_0(%arg0: i32, %arg1: i32) -> (i32, i32) {
    %c0_i32 = arith.constant 0 : i32
    %c0_i32_0 = arith.constant 0 : i32
    return %arg0, %c0_i32 : i32, i32
  }
  func.func @transform_1(%arg0: i32, %arg1: i32) -> (i32, i32) {
    %c0_i32 = arith.constant 0 : i32
    %c0_i32_0 = arith.constant 0 : i32
    return %c0_i32, %arg1 : i32, i32
  }
  func.func @transform_2(%arg0: i32, %arg1: i32) -> (i32, i32) {
    %c0_i32 = arith.constant 0 : i32
    %c0_i32_0 = arith.constant 0 : i32
    return %c0_i32, %arg1 : i32, i32
  }
  func.func @transform_3(%arg0: i32, %arg1: i32) -> (i32, i32) {
    %c0_i32 = arith.constant 0 : i32
    return %arg0, %arg1 : i32, i32
  }
}

</mosaic_0001>

<bundles_post_ra>
// kernel: linear_textual_head.1
= control target key start
LH: loop header
LB: loop body
LE: loop exit
PB: predicated region body
PF: predicated region fallthrough
CT: control target
= control target key end

     0   :  { %8 = vsyncpa [#allocation3], 0  ;;  %s331_s0 = inlined_call_operand.vmem [shape: bf16[16,128], index: 0, kind: input, shape index: {}]   ;;  %s332_s1 = inlined_call_operand.hbm [shape: bf16[128,128], index: 1, kind: input, shape index: {}]   ;;  %s333_s2 = inlined_call_operand.vmem [shape: f32[1,128], index: 2, kind: input, shape index: {}]   ;;  %s334_s3 = inlined_call_operand.hbm [shape: f32[16,128], index: 3, kind: output, shape index: {}]  }
   0x1   :  { %9 = vsyncpa [#allocation4], 0  ;;  %s273_s12 = smov [#allocation2]   ;;  %s225_s16 = scalar_lea.hbm %s332_s1, 1024 }
   0x2   :  { %s17_s13 = sshll.u32 %s273_s12, 4  ;;  %p226_p0 = scmp.ne.s32.totalorder %s332_s1, %s225_s16  ;;  %s18_s13 = int_to_ptr.vmem [resolvable:$true] %s17_s13 }
   0x3   :  { %p229_p1 = scmp.lt.u32.totalorder %s225_s16, %s332_s1 }
   0x5   :  { %p231_p2 = pnand %p229_p1, %p226_p0 }
   0x7   :  { %234 = shalt.err (!%p231_p2)
}
   0x8   :  { %s235_s21 = scalar_lea.vmem %s18_s13, 1024  ;;  %p240_p4 = scmp.lt.s32.totalorder %s18_s13, %s18_s13 }
   0x9   :  { %p236_p3 = scmp.ne.s32.totalorder %s18_s13, %s235_s21  ;;  %p241_p5 = scmp.lt.s32.totalorder %s235_s21, %s235_s21 }
   0xb   :  { %p242_p6 = por %p241_p5, %p240_p4 }
   0xd   :  { %p243_p7 = pnand %p242_p6, %p236_p3 }
   0xf   :  { %246 = shalt.err (!%p243_p7)
}
  0x10   :  { %s274_s22 = smov 64   ;;  %s275_s23 = smov 4  }
  0x11   :  { %23 = dma.hbm_to_vmem [thread:$0]  %s332_s1, 1024, %s18_s13, [#allocation3], %s274_s22, %s274_s22, %s275_s23  }
  0x12   :  { %269 = dma.done.wait [#allocation3], 1024  }
  0x13   :  { %270 = vsyncadd [#allocation3], 4294966272  ;;  %v276_v0 = vmov 0.0   ;;  %vm277_vm0 = vmmov 0   ;;  %v216_v1 = vld [vmem:[#allocation2] sm:$0xff]   ;;  %v217_v2 = vld [vmem:[#allocation2 + $0x8] sm:$0xff]  }
  0x14   :  { %188 = vmatprep.subr.bf16.mxu0 %v276_v0  ;;  %204 = vmatprep.mubr.msk.bf16.mxu0 %vm277_vm0, %v276_v0  ;;  %v218_v3 = vld [vmem:[#allocation2 + $0x10] sm:$0xff]   ;;  %v219_v4 = vld [vmem:[#allocation2 + $0x18] sm:$0xff]   ;;  %v220_v5 = vld [vmem:[#allocation2 + $0x20] sm:$0xff]   ;;  %s278_s29 = smov [#allocation5]  }
  0x15   :  { %189 = vmatpush3.bf16.msra.mxu0 %v216_v1  ;;  %v221_v6 = vld [vmem:[#allocation2 + $0x28] sm:$0xff]   ;;  %v222_v7 = vld [vmem:[#allocation2 + $0x30] sm:$0xff]   ;;  %v223_v8 = vld [vmem:[#allocation2 + $0x38] sm:$0xff]   ;;  %s157_s30 = sshll.u32 %s278_s29, 4  ;;  %s158_s30 = int_to_ptr.vmem [resolvable:$true] %s157_s30 }
  0x16   :  { %190 = vmatprep.subr.bf16.mxu0 %v276_v0  ;;  %v224_v9 = vld [vmem:[%s331_s0] sm:$0xff]   ;;  %s247_s4 = scalar_lea.vmem %s158_s30, 256  ;;  %p252_p9 = scmp.lt.s32.totalorder %s158_s30, %s158_s30 }
  0x17   :  { %v169_v10 = vld [vmem:[%s333_s2] ss:$0 sm:$0xff]  ;;  %p248_p8 = scmp.ne.s32.totalorder %s158_s30, %s247_s4  ;;  %p253_p10 = scmp.lt.s32.totalorder %s247_s4, %s247_s4 }
  0x19   :  { %191 = vmatpush3.bf16.msra.mxu0 %v217_v2  ;;  %p254_p11 = por %p253_p10, %p252_p9 }
  0x1a   :  { %192 = vmatprep.subr.bf16.mxu0 %v276_v0 }
  0x1b   :  { %p255_p12 = pnand %p254_p11, %p248_p8 }
  0x1d   :  { %193 = vmatpush3.bf16.msra.mxu0 %v218_v3 }
  0x1e   :  { %194 = vmatprep.subr.bf16.mxu0 %v276_v0 }
  0x21   :  { %195 = vmatpush3.bf16.msra.mxu0 %v219_v4 }
  0x22   :  { %196 = vmatprep.subr.bf16.mxu0 %v276_v0 }
  0x25   :  { %197 = vmatpush3.bf16.msra.mxu0 %v220_v5 }
  0x26   :  { %198 = vmatprep.subr.bf16.mxu0 %v276_v0 }
  0x29   :  { %199 = vmatpush3.bf16.msra.mxu0 %v221_v6 }
  0x2a   :  { %200 = vmatprep.subr.bf16.mxu0 %v276_v0 }
  0x2d   :  { %201 = vmatpush3.bf16.msra.mxu0 %v222_v7 }
  0x2e   :  { %202 = vmatprep.subr.bf16.mxu0 %v276_v0 }
  0x31   :  { %203 = vmatpush3.bf16.msra.mxu0 %v223_v8 }
  0x34   :  { %205 = vmatmul.mubr.bf16.vlgmr.msra.gmra.mrb[0].mxu0 %v224_v9 }
 0x107   :  { %v143_v11 = vpop.f32.mrb[0].mxu0 }
 0x108   :  { %v144_v12 = vadd.f32 %v169_v10, %v143_v11  ;;  %v206_v13 = vpop.f32.mrb[1].mxu0 }
 0x109   :  { %v146_v14 = vpop.f32.mrb[2].mxu0 }
 0x10a   :  { %150 = vst [vmem:[#allocation5] sm:$0xff] %v144_v12  ;;  %v147_v15 = vadd.f32 %v169_v10, %v146_v14  ;;  %v207_v16 = vpop.f32.mrb[3].mxu0 }
 0x10c   :  { %151 = vst [vmem:[#allocation5 + $0x8] sm:$0xff] %v147_v15 }
 0x10d   :  { %258 = shalt.err (!%p255_p12)
}
 0x10e   :  { %s259_s5 = scalar_lea.hbm %s334_s3, 256 }
 0x10f   :  { %p260_p13 = scmp.ne.s32.totalorder %s334_s3, %s259_s5  ;;  %p263_p0 = scmp.lt.u32.totalorder %s259_s5, %s334_s3 }
 0x111   :  { %p265_p1 = pnand %p263_p0, %p260_p13 }
 0x113   :  { %268 = shalt.err (!%p265_p1)
}
 0x114   :  { %s279_s10 = smov 128   ;;  %s280_s11 = smov 8  }
 0x115   :  { %163 = dma.vmem_to_hbm [thread:$0]  %s158_s30, 256, %s334_s3, [#allocation4], %s279_s10, %s279_s10, %s280_s11  }
 0x116   :  { %271 = dma.done.wait [#allocation4], 256  }
 0x117   :  { %272 = vsyncadd [#allocation4], 4294967040 }
 0x118   :  { %167 = vsyncpa [#allocation3], 1 }
 0x119   :  { %168 = vsyncpa [#allocation4], 1 }

</bundles_post_ra>
